<compile_context>
chip_gen: v5e
topology: v5e:2x2
jax: 0.10.0
libtpu: 0.0.40
codegen_flags: <defaults>
</compile_context>

<pallas_src>
import functools

import numpy as np
import jax
import jax.numpy as jnp
from jax.experimental import pallas as pl
from jax.experimental.pallas import tpu as pltpu

BN_EPS = 1e-5
LANE = 128     # conv-output channel dims are zero-padded to a multiple of the vreg lane width
SUBLANE = 8    # M (row) tiles are multiples of the vreg sublane width


# ---------------------------------------------------------------------------
# small helpers
# ---------------------------------------------------------------------------
def _round_up(x, m):
    return (x + m - 1) // m * m


@functools.lru_cache(maxsize=None)
def _hw_params():
    """(max_tile_m, vmem_limit_bytes), gated per TPU generation.

    v5e/v6e have 128 MiB VMEM per core -> afford bigger M tiles (fewer grid steps, longer DMA
    bursts).  v7x has only 64 MiB per TensorCore, so keep the conservative budget there (also the
    fallback when the query is unavailable)."""
    vmem_bytes = 0
    try:
        info = pltpu.get_tpu_info()
        vmem_bytes = int(getattr(info, "vmem_capacity_bytes", 0) or 0)
    except Exception:
        vmem_bytes = 0
    if vmem_bytes >= 100 * 1024 * 1024:
        return 2048, 64 * 1024 * 1024
    return 1024, 32 * 1024 * 1024


def _tiles(m_true, max_tile_m):
    """Pick the M tile.  Prefer a power-of-two tile that exactly divides round_up(M, 8) so no row
    padding / output slicing (extra HBM passes) is needed; otherwise cap padded waste at 12.5%."""
    m_base = _round_up(m_true, SUBLANE)
    limit = min(max_tile_m, m_base)
    best_exact = SUBLANE
    t = SUBLANE
    while t <= limit:
        if m_base % t == 0:
            best_exact = t
        t *= 2
    if best_exact >= 512 or best_exact == limit:
        tile_m = best_exact
    else:
        # Awkward M (no sizeable exact divisor): allow a bigger tile with <= 12.5% padded rows.
        # SpoofFaceNet's even spatial dims / pow-2-ish channel counts never hit this branch.
        tile_m = best_exact
        t = best_exact * 2
        while t <= limit:
            pad = _round_up(m_base, t) - m_base
            if pad * 8 <= m_base:
                tile_m = t
            t *= 2
    m_pad = _round_up(m_true, tile_m)
    return tile_m, m_pad


def _pad_rows(a, rows):
    if a.shape[0] == rows:
        return a
    return jnp.pad(a, ((0, rows - a.shape[0]), (0, 0)))


def _pad_vec(v, c_pad, pad_value):
    v = v.reshape(1, -1).astype(jnp.float32)
    if v.shape[1] == c_pad:
        return v
    return jnp.pad(v, ((0, 0), (0, c_pad - v.shape[1])), constant_values=pad_value)


def _pad_channels_nhwc(x, c_pad):
    c = x.shape[-1]
    if c == c_pad:
        return x
    return jnp.pad(x, ((0, 0), (0, 0), (0, 0), (0, c_pad - c)))


# ---------------------------------------------------------------------------
# Pallas kernels
# ---------------------------------------------------------------------------
def _matmul_stats_kernel(x_ref, w_ref, y_ref, sum_ref, sq_ref):
    """Pass 1 (pointwise conv / linear): y = x @ w on the MXU (f32 accumulation) + this tile's
    per-channel partial sum / sum-of-squares.  Every output block index depends on the grid step,
    so the axis is fully 'parallel' (megacore-friendly on v7x) -- no resident accumulator."""
    y = jnp.dot(x_ref[...], w_ref[...], preferred_element_type=jnp.float32)
    y_ref[...] = y.astype(y_ref.dtype)
    sum_ref[...] = jnp.sum(y, axis=0, keepdims=True).reshape(sum_ref.shape)
    sq_ref[...] = jnp.sum(y * y, axis=0, keepdims=True).reshape(sq_ref.shape)


def _stats_kernel(y_ref, sum_ref, sq_ref):
    """Pass 1 (conv output already materialized by XLA): per-tile partial sum / sum-of-squares."""
    y = y_ref[...].astype(jnp.float32)
    sum_ref[...] = jnp.sum(y, axis=0, keepdims=True).reshape(sum_ref.shape)
    sq_ref[...] = jnp.sum(y * y, axis=0, keepdims=True).reshape(sq_ref.shape)


def _scale_shift_kernel(y_ref, scale_ref, shift_ref, alpha_ref, o_ref, *, with_prelu):
    """Pass 2: out = y * scale + shift [+ PReLU], with precomputed per-channel scale / shift."""
    out = y_ref[...].astype(jnp.float32) * scale_ref[...] + shift_ref[...]
    if with_prelu:
        out = jnp.where(out >= 0.0, out, alpha_ref[...] * out)
    o_ref[...] = out.astype(o_ref.dtype)


def _finalize_stats(part_sum, part_sq, gamma, beta, m_count):
    """Reduce the (grid_m, 1, Cpad) partials and fold BN into per-channel scale / shift (tiny)."""
    s = jnp.sum(part_sum, axis=0)
    sq = jnp.sum(part_sq, axis=0)
    inv_m = 1.0 / float(m_count)
    mean = s * inv_m
    # TODO(synk): E[y^2]-E[y]^2 can cancel catastrophically when |mean| >> std at very large M;
    # switch to a centered second pass / Welford accumulation if that regime shows up.
    var = jnp.maximum(sq * inv_m - mean * mean, 0.0)   # biased var (PyTorch training-mode BN)
    scale = jax.lax.rsqrt(var + BN_EPS) * gamma
    shift = beta - mean * scale
    return scale, shift


# ---------------------------------------------------------------------------
# pallas_call wrappers (tiled over M = N*H*W)
# ---------------------------------------------------------------------------
def _bn_apply(y, scale, shift, alpha, *, tile_m, out_dtype, with_prelu, vmem_limit):
    m_pad, c_pad = y.shape
    grid_m = m_pad // tile_m
    # TODO(synk): scale/shift/alpha (and w in pass 1) are constant-index blocks; single-buffering
    # them (pipeline_mode=pl.Buffered(1)) would free a little VMEM, left default for safety.
    return pl.pallas_call(
        functools.partial(_scale_shift_kernel, with_prelu=with_prelu),
        out_shape=jax.ShapeDtypeStruct((m_pad, c_pad), out_dtype),
        grid=(grid_m,),
        in_specs=[
            pl.BlockSpec((tile_m, c_pad), lambda i: (i, 0)),
            pl.BlockSpec((1, c_pad), lambda i: (0, 0)),
            pl.BlockSpec((1, c_pad), lambda i: (0, 0)),
            pl.BlockSpec((1, c_pad), lambda i: (0, 0)),
        ],
        out_specs=pl.BlockSpec((tile_m, c_pad), lambda i: (i, 0)),
        compiler_params=pltpu.CompilerParams(
            dimension_semantics=("parallel",), vmem_limit_bytes=vmem_limit),
    )(y, scale, shift, alpha)


def _fused_matmul_bn(x2d, w2d, gamma, beta, alpha, *, out_dtype, compute_dtype, with_prelu):
    """x2d: [M, K]; w2d: [K, Cpad] with Cpad % 128 == 0 (zero-padded output channels)."""
    m_true, k = x2d.shape
    c_pad = w2d.shape[1]
    max_tile_m, vmem_limit = _hw_params()
    tile_m, m_pad = _tiles(m_true, max_tile_m)
    grid_m = m_pad // tile_m

    x_mm = _pad_rows(x2d.astype(compute_dtype), m_pad)   # no-op in the common (divisible-M) case
    w_mm = w2d.astype(compute_dtype)

    y, psum, psq = pl.pallas_call(
        _matmul_stats_kernel,
        out_shape=(
            jax.ShapeDtypeStruct((m_pad, c_pad), compute_dtype),   # bf16 intermediate by default
            jax.ShapeDtypeStruct((grid_m, 1, c_pad), jnp.float32),
            jax.ShapeDtypeStruct((grid_m, 1, c_pad), jnp.float32),
        ),
        grid=(grid_m,),
        in_specs=[
            pl.BlockSpec((tile_m, k), lambda i: (i, 0)),
            pl.BlockSpec((k, c_pad), lambda i: (0, 0)),
        ],
        out_specs=(
            pl.BlockSpec((tile_m, c_pad), lambda i: (i, 0)),
            pl.BlockSpec((1, 1, c_pad), lambda i: (i, 0, 0)),
            pl.BlockSpec((1, 1, c_pad), lambda i: (i, 0, 0)),
        ),
        compiler_params=pltpu.CompilerParams(
            dimension_semantics=("parallel",), vmem_limit_bytes=vmem_limit),
    )(x_mm, w_mm)

    scale, shift = _finalize_stats(psum, psq, gamma, beta, m_true)
    out = _bn_apply(y, scale, shift, alpha, tile_m=tile_m, out_dtype=out_dtype,
                    with_prelu=with_prelu, vmem_limit=vmem_limit)
    return out if m_pad == m_true else out[:m_true]


def _bn_only(y2d, gamma, beta, alpha, *, out_dtype, with_prelu):
    """Two-pass BN(+PReLU) over a materialized conv output [M, Cpad] (kept in its conv dtype)."""
    m_true, c_pad = y2d.shape
    max_tile_m, vmem_limit = _hw_params()
    tile_m, m_pad = _tiles(m_true, max_tile_m)
    grid_m = m_pad // tile_m
    y2d = _pad_rows(y2d, m_pad)

    psum, psq = pl.pallas_call(
        _stats_kernel,
        out_shape=(
            jax.ShapeDtypeStruct((grid_m, 1, c_pad), jnp.float32),
            jax.ShapeDtypeStruct((grid_m, 1, c_pad), jnp.float32),
        ),
        grid=(grid_m,),
        in_specs=[pl.BlockSpec((tile_m, c_pad), lambda i: (i, 0))],
        out_specs=(
            pl.BlockSpec((1, 1, c_pad), lambda i: (i, 0, 0)),
            pl.BlockSpec((1, 1, c_pad), lambda i: (i, 0, 0)),
        ),
        compiler_params=pltpu.CompilerParams(
            dimension_semantics=("parallel",), vmem_limit_bytes=vmem_limit),
    )(y2d)

    scale, shift = _finalize_stats(psum, psq, gamma, beta, m_true)
    out = _bn_apply(y2d, scale, shift, alpha, tile_m=tile_m, out_dtype=out_dtype,
                    with_prelu=with_prelu, vmem_limit=vmem_limit)
    return out if m_pad == m_true else out[:m_true]


# ---------------------------------------------------------------------------
# ConvBn / ConvBnPrelu blocks (NHWC, channel-padded outputs, composable)
# ---------------------------------------------------------------------------
def conv_bn_nhwc(x, weight, gamma, beta, *, stride=1, padding=0, groups=1, prelu_alpha=None,
                 compute_dtype=jnp.bfloat16, out_dtype=None):
    """One ConvBn[Prelu]_Block on an NHWC activation.  The input channel dim may be the true Cin
    or its zero-padded lane multiple (stacked blocks keep the padded layout end-to-end).  Returns
    NHWC with out-channels zero-padded to a multiple of 128 (the padding stays exactly zero)."""
    n, h, w_sp, c_in_eff = x.shape
    out_c, in_per_group, kh, kw = weight.shape
    in_c = in_per_group * groups
    c_out_pad = _round_up(out_c, LANE)
    if out_dtype is None:
        out_dtype = compute_dtype

    gamma_p = _pad_vec(gamma, c_out_pad, 0.0)   # gamma pad 0 -> padded output channels stay 0
    beta_p = _pad_vec(beta, c_out_pad, 0.0)
    if prelu_alpha is None:
        alpha_p = jnp.ones((1, c_out_pad), jnp.float32)
        with_prelu = False
    else:
        alpha_p = _pad_vec(prelu_alpha, c_out_pad, 1.0)
        with_prelu = True

    if kh == 1 and kw == 1 and groups == 1 and stride == 1 and padding == 0:
        # Pointwise conv: lane-dense [M, Kpad] @ [Kpad, Cpad] matmul fused with the BN stats pass.
        c_in_pad = _round_up(in_c, LANE)
        if c_in_eff != c_in_pad:
            x = _pad_channels_nhwc(x, c_in_pad)     # boundary-only; stacked flows arrive padded
        m = n * h * w_sp
        x2d = x.reshape(m, c_in_pad)
        w2d = jnp.zeros((c_in_pad, c_out_pad), jnp.float32)
        w2d = w2d.at[:in_c, :out_c].set(weight.reshape(out_c, in_c).T.astype(jnp.float32))
        y2d = _fused_matmul_bn(x2d, w2d, gamma_p, beta_p, alpha_p, out_dtype=out_dtype,
                               compute_dtype=compute_dtype, with_prelu=with_prelu)
        return y2d.reshape(n, h, w_sp, c_out_pad)

    # Spatial / depthwise conv: NHWC lax.conv (no im2col, no input-channel padding) feeding the
    # two-pass Pallas BN(+PReLU).  bf16 operands + DEFAULT precision on the fast path; HIGHEST
    # only on the f32 debug path (f32 matmul is emulated on every TPU generation).
    prec = (jax.lax.Precision.HIGHEST
            if np.dtype(compute_dtype) == np.dtype(np.float32)
            else jax.lax.Precision.DEFAULT)
    if groups == 1:
        w_hwio = jnp.zeros((kh, kw, c_in_eff, c_out_pad), compute_dtype)
        w_hwio = w_hwio.at[:, :, :in_c, :out_c].set(
            jnp.transpose(weight, (2, 3, 1, 0)).astype(compute_dtype))
        fgc = 1
    elif groups == in_c and out_c == in_c:
        # Depthwise (all grouped convs in SpoofFaceNet are depthwise).  A channel-padded input is
        # convolved as-is (zero weights on zero channels) so the output is already lane-padded.
        fgc = c_in_eff
        w_hwio = jnp.zeros((kh, kw, 1, c_in_eff), compute_dtype)
        w_hwio = w_hwio.at[:, :, :, :out_c].set(
            jnp.transpose(weight, (2, 3, 1, 0)).astype(compute_dtype))
    else:
        # TODO(synk): general grouped conv (1 < groups < in_c) is not used by SpoofFaceNet.
        raise NotImplementedError("only groups == 1 or depthwise (groups == in_c == out_c)")

    y = jax.lax.conv_general_dilated(
        x.astype(compute_dtype), w_hwio, window_strides=(stride, stride),
        padding=[(padding, padding), (padding, padding)],
        dimension_numbers=("NHWC", "HWIO", "NHWC"),
        feature_group_count=fgc, precision=prec)
    if y.shape[-1] != c_out_pad:
        # Only hit by a depthwise conv on an unpadded activation whose Cin is not a lane multiple
        # (PyTorch-compat boundary); stacked flows keep the padded NHWC layout and skip this copy.
        y = _pad_channels_nhwc(y, c_out_pad)
    n2, ho, wo, _ = y.shape
    # TODO(synk): the 3x3 depthwise conv could be fused into the Pallas stats kernel as 9 shifted
    # VPU MACs to avoid materializing y once more in HBM; left to XLA for now.
    y2d = _bn_only(y.reshape(n2 * ho * wo, c_out_pad), gamma_p, beta_p, alpha_p,
                   out_dtype=out_dtype, with_prelu=with_prelu)
    return y2d.reshape(n2, ho, wo, c_out_pad)


def conv_bn_block(x_nchw, weight, gamma, beta, *, stride=1, padding=0, groups=1,
                  prelu_alpha=None, compute_dtype=jnp.bfloat16):
    """PyTorch-compatible ConvBn_Block / ConvBnPrelu_Block forward (NCHW in, NCHW out).  When
    stacking blocks, prefer conv_bn_nhwc / depthwise_res_nhwc and keep the padded bf16 NHWC
    activation end-to-end instead of paying the boundary transpose per layer."""
    out_c = weight.shape[0]
    x = jnp.transpose(x_nchw, (0, 2, 3, 1))   # channels NOT pre-padded; the kernels accept any Cin
    y = conv_bn_nhwc(x, weight, gamma, beta, stride=stride, padding=padding, groups=groups,
                     prelu_alpha=prelu_alpha, compute_dtype=compute_dtype,
                     out_dtype=x_nchw.dtype)  # pass 2 stores the boundary dtype directly
    return jnp.transpose(y[..., :out_c], (0, 3, 1, 2))


def depthwise_res_nhwc(x, p, *, stride=1, padding=1, compute_dtype=jnp.bfloat16):
    """DepthWiseRes_Block on a channel-padded NHWC activation of dtype compute_dtype; activations
    stay bf16 + padded NHWC across all three fused layers and the residual."""
    y = conv_bn_nhwc(x, p["w1"], p["g1"], p["b1"], prelu_alpha=p["a1"], compute_dtype=compute_dtype)
    y = conv_bn_nhwc(y, p["w2"], p["g2"], p["b2"], stride=stride, padding=padding,
                     groups=p["w2"].shape[0], prelu_alpha=p["a2"], compute_dtype=compute_dtype)
    y = conv_bn_nhwc(y, p["w3"], p["g3"], p["b3"], compute_dtype=compute_dtype)
    return x + y                               # residual; zero channel padding stays zero


def depthwise_res_block(x_nchw, p, *, stride=1, padding=1, compute_dtype=jnp.bfloat16):
    """PyTorch-compatible DepthWiseRes_Block forward (NCHW boundary)."""
    in_c = x_nchw.shape[1]
    out_c = p["w3"].shape[0]
    x = _pad_channels_nhwc(jnp.transpose(x_nchw, (0, 2, 3, 1)),
                           _round_up(in_c, LANE)).astype(compute_dtype)
    y = depthwise_res_nhwc(x, p, stride=stride, padding=padding, compute_dtype=compute_dtype)
    return jnp.transpose(y[..., :out_c], (0, 3, 1, 2)).astype(x_nchw.dtype)


def linear_bn_block(x, weight, gamma, beta, *, compute_dtype=jnp.bfloat16):
    """Linear(bias=False) + BatchNorm1d (training stats) head: the same fused matmul+BN kernel
    with M = batch."""
    emb = weight.shape[0]
    c_pad = _round_up(emb, LANE)
    w2d = jnp.zeros((weight.shape[1], c_pad), jnp.float32)
    w2d = w2d.at[:, :emb].set(weight.T.astype(jnp.float32))
    out = _fused_matmul_bn(x, w2d, _pad_vec(gamma, c_pad, 0.0), _pad_vec(beta, c_pad, 0.0),
                           jnp.ones((1, c_pad), jnp.float32), out_dtype=x.dtype,
                           compute_dtype=compute_dtype, with_prelu=False)
    return out[:, :emb]


# ---------------------------------------------------------------------------
# pure-JAX references (PyTorch semantics, NCHW)
# ---------------------------------------------------------------------------
def _ref_conv_bn(x, weight, gamma, beta, stride, padding, groups, prelu_alpha=None):
    y = jax.lax.conv_general_dilated(
        x, weight, (stride, stride), [(padding, padding), (padding, padding)],
        dimension_numbers=("NCHW", "OIHW", "NCHW"),
        feature_group_count=groups, precision=jax.lax.Precision.HIGHEST)
    mean = y.mean(axis=(0, 2, 3), keepdims=True)
    var = y.var(axis=(0, 2, 3), keepdims=True)      # biased, as in PyTorch training-mode BN
    y = (y - mean) / jnp.sqrt(var + BN_EPS) * gamma.reshape(1, -1, 1, 1) + beta.reshape(1, -1, 1, 1)
    if prelu_alpha is not None:
        y = jnp.where(y >= 0, y, prelu_alpha.reshape(1, -1, 1, 1) * y)
    return y


def _ref_depthwise_res(x, p, *, stride=1, padding=1):
    y = _ref_conv_bn(x, p["w1"], p["g1"], p["b1"], 1, 0, 1, p["a1"])
    y = _ref_conv_bn(y, p["w2"], p["g2"], p["b2"], stride, padding, p["w2"].shape[0], p["a2"])
    y = _ref_conv_bn(y, p["w3"], p["g3"], p["b3"], 1, 0, 1, None)
    return x + y


def _ref_linear_bn(x, weight, gamma, beta):
    y = x @ weight.T
    mean = y.mean(axis=0, keepdims=True)
    var = y.var(axis=0, keepdims=True)
    return (y - mean) / jnp.sqrt(var + BN_EPS) * gamma.reshape(1, -1) + beta.reshape(1, -1)


# ---------------------------------------------------------------------------
# demo / self-check
# ---------------------------------------------------------------------------
if __name__ == "__main__":
    keys = iter(jax.random.split(jax.random.PRNGKey(0), 64))
    nk = lambda: next(keys)
    checks = []

    # 1) ConvBn_Block(4, 8) 1x1 on (2, 4, 16, 16): strict f32 path (structure) + default bf16 path.
    x1 = jax.random.normal(nk(), (2, 4, 16, 16), jnp.float32)
    w1 = 0.1 * jax.random.normal(nk(), (8, 4, 1, 1), jnp.float32)
    g1 = 1.0 + 0.1 * jax.random.normal(nk(), (8,), jnp.float32)
    b1 = 0.1 * jax.random.normal(nk(), (8,), jnp.float32)
    ref1 = _ref_conv_bn(x1, w1, g1, b1, 1, 0, 1)
    checks.append(("convbn_1x1_f32",
                   conv_bn_block(x1, w1, g1, b1, compute_dtype=jnp.float32), ref1, 2e-3))
    checks.append(("convbn_1x1_bf16", conv_bn_block(x1, w1, g1, b1), ref1, 6e-2))

    # 2) ConvBnPrelu_Block(64, 128) 1x1 on (2, 64, 32, 32): M = 2048 -> multi-tile grid, bf16.
    x2 = jax.random.normal(nk(), (2, 64, 32, 32), jnp.float32)
    w2 = 0.05 * jax.random.normal(nk(), (128, 64, 1, 1), jnp.float32)
    g2 = 1.0 + 0.1 * jax.random.normal(nk(), (128,), jnp.float32)
    b2 = 0.1 * jax.random.normal(nk(), (128,), jnp.float32)
    a2 = 0.25 + 0.05 * jax.random.normal(nk(), (128,), jnp.float32)
    checks.append(("convbnprelu_1x1_bf16", conv_bn_block(x2, w2, g2, b2, prelu_alpha=a2),
                   _ref_conv_bn(x2, w2, g2, b2, 1, 0, 1, a2), 6e-2))

    # 3) Stem ConvBnPrelu_Block(1, 64, 3x3, stride 2, padding 1) on (2, 1, 16, 16):
    #    spatial path with UNPADDED Cin=1 (no conv-input channel inflation), bf16 DEFAULT conv.
    x3 = jax.random.normal(nk(), (2, 1, 16, 16), jnp.float32)
    w3 = 0.1 * jax.random.normal(nk(), (64, 1, 3, 3), jnp.float32)
    g3 = 1.0 + 0.1 * jax.random.normal(nk(), (64,), jnp.float32)
    b3 = 0.1 * jax.random.normal(nk(), (64,), jnp.float32)
    a3 = 0.25 + 0.05 * jax.random.normal(nk(), (64,), jnp.float32)
    checks.append(("stem_convbnprelu_3x3_s2_bf16",
                   conv_bn_block(x3, w3, g3, b3, stride=2, padding=1, prelu_alpha=a3),
                   _ref_conv_bn(x3, w3, g3, b3, 2, 1, 1, a3), 6e-2))

    # 4) DepthWiseRes_Block(64, 64, k=3, s=1, p=1, groups=128) on (2, 64, 16, 16):
    #    ConvBnPrelu(1x1,64->128) -> ConvBnPrelu(3x3 dw,128) -> ConvBn(1x1,128->64) + skip, with the
    #    activation kept channel-padded bf16 NHWC end-to-end.  Strict f32 path checks the structure.
    x4 = jax.random.normal(nk(), (2, 64, 16, 16), jnp.float32)
    p = {
        "w1": 0.05 * jax.random.normal(nk(), (128, 64, 1, 1), jnp.float32),
        "g1": 1.0 + 0.1 * jax.random.normal(nk(), (128,), jnp.float32),
        "b1": 0.1 * jax.random.normal(nk(), (128,), jnp.float32),
        "a1": 0.25 + 0.05 * jax.random.normal(nk(), (128,), jnp.float32),
        "w2": 0.1 * jax.random.normal(nk(), (128, 1, 3, 3), jnp.float32),
        "g2": 1.0 + 0.1 * jax.random.normal(nk(), (128,), jnp.float32),
        "b2": 0.1 * jax.random.normal(nk(), (128,), jnp.float32),
        "a2": 0.25 + 0.05 * jax.random.normal(nk(), (128,), jnp.float32),
        "w3": 0.05 * jax.random.normal(nk(), (64, 128, 1, 1), jnp.float32),
        "g3": 1.0 + 0.1 * jax.random.normal(nk(), (64,), jnp.float32),
        "b3": 0.1 * jax.random.normal(nk(), (64,), jnp.float32),
    }
    ref4 = _ref_depthwise_res(x4, p)
    checks.append(("depthwise_res_f32",
                   depthwise_res_block(x4, p, compute_dtype=jnp.float32), ref4, 2e-3))
    checks.append(("depthwise_res_bf16", depthwise_res_block(x4, p), ref4, 2e-1))

    # 5) Linear(256 -> 64, bias=False) + BatchNorm1d head on batch 16 (same fused kernel, M=batch).
    x5 = jax.random.normal(nk(), (16, 256), jnp.float32)
    w5 = 0.05 * jax.random.normal(nk(), (64, 256), jnp.float32)
    g5 = 1.0 + 0.1 * jax.random.normal(nk(), (64,), jnp.float32)
    b5 = 0.1 * jax.random.normal(nk(), (64,), jnp.float32)
    checks.append(("linear_bn1d_bf16", linear_bn_block(x5, w5, g5, b5),
                   _ref_linear_bn(x5, w5, g5, b5), 6e-2))

    for name, out, ref, tol in checks:
        out = jax.block_until_ready(out)
        assert out.shape == ref.shape, f"{name}: shape {out.shape} vs {ref.shape}"
        err = float(jnp.max(jnp.abs(out - ref)))
        assert jnp.allclose(out, ref, atol=tol, rtol=tol), f"{name}: max abs err {err:.2e}"

    # TODO(synk): the full SpoofFaceNet graph (conv1..conv10 + Flatten + Linear + BatchNorm1d)
    # composes directly from conv_bn_nhwc / depthwise_res_nhwc / linear_bn_block; it is not
    # instantiated here to keep the demo small.
    print("KERNEL_OK")
</pallas_src>

<mosaic_0001>
module attributes {stable_mosaic.version = 11 : i64} {
  func.func @_matmul_stats_kernel(%arg0: i32, %arg1: memref<512x128xf32, #tpu.memory_space<vmem>>, %arg2: memref<128x128xf32, #tpu.memory_space<vmem>>, %arg3: memref<512x128xf32, #tpu.memory_space<vmem>>, %arg4: memref<1x1x128xf32, #tpu.memory_space<vmem>>, %arg5: memref<1x1x128xf32, #tpu.memory_space<vmem>>) attributes {dimension_semantics = [#tpu.dimension_semantics<parallel>], iteration_bounds = array<i64: 1>, scalar_prefetch = 0 : i64, scratch_operands = 0 : i64, tpu.core_type = #tpu.core_type<tc>, window_params = [{transform_indices = @transform_0, window_bounds = array<i64: 512, 128>}, {pipeline_mode = #tpu.pipeline_mode<synchronous>, transform_indices = @transform_1, window_bounds = array<i64: 128, 128>}, {transform_indices = @transform_2, window_bounds = array<i64: 512, 128>}, {transform_indices = @transform_3, window_bounds = array<i64: 1, 1, 128>}, {transform_indices = @transform_4, window_bounds = array<i64: 1, 1, 128>}]} {
    %c0 = arith.constant 0 : index
    %c0_0 = arith.constant 0 : index
    %0 = vector.load %arg1[%c0, %c0_0] : memref<512x128xf32, #tpu.memory_space<vmem>>, vector<512x128xf32>
    %c0_1 = arith.constant 0 : index
    %c0_2 = arith.constant 0 : index
    %1 = vector.load %arg2[%c0_1, %c0_2] : memref<128x128xf32, #tpu.memory_space<vmem>>, vector<128x128xf32>
    %cst = arith.constant dense<0.000000e+00> : vector<512x128xf32>
    %2 = tpu.matmul %0, %1, %cst {dimension_numbers = #tpu.dot_dimension_numbers<[1], [0], [0], [1], [0, 0, 1, 1], [], []>} : vector<512x128xf32>, vector<128x128xf32>, vector<512x128xf32> -> vector<512x128xf32>
    %c0_3 = arith.constant 0 : index
    %c0_4 = arith.constant 0 : index
    %3 = vector.load %arg3[%c0_3, %c0_4] : memref<512x128xf32, #tpu.memory_space<vmem>>, vector<512x128xf32>
    tpu.vector_store %arg3[%c0_3, %c0_4], %2 {strides = array<i32>} : memref<512x128xf32, #tpu.memory_space<vmem>>, vector<512x128xf32>,
    %cst_5 = arith.constant dense<0.000000e+00> : vector<128xf32>
    %4 = vector.multi_reduction <add>, %2, %cst_5 [0] : vector<512x128xf32> to vector<128xf32>
    %5 = vector.shape_cast %4 : vector<128xf32> to vector<1x128xf32>
    %6 = vector.shape_cast %5 : vector<1x128xf32> to vector<1x1x128xf32>
    %c0_6 = arith.constant 0 : index
    %c0_7 = arith.constant 0 : index
    %c0_8 = arith.constant 0 : index
    %7 = vector.load %arg4[%c0_6, %c0_7, %c0_8] : memref<1x1x128xf32, #tpu.memory_space<vmem>>, vector<1x1x128xf32>
    tpu.vector_store %arg4[%c0_6, %c0_7, %c0_8], %6 {strides = array<i32>} : memref<1x1x128xf32, #tpu.memory_space<vmem>>, vector<1x1x128xf32>,
    %8 = arith.mulf %2, %2 : vector<512x128xf32>
    %cst_9 = arith.constant dense<0.000000e+00> : vector<128xf32>
    %9 = vector.multi_reduction <add>, %8, %cst_9 [0] : vector<512x128xf32> to vector<128xf32>
    %10 = vector.shape_cast %9 : vector<128xf32> to vector<1x128xf32>
    %11 = vector.shape_cast %10 : vector<1x128xf32> to vector<1x1x128xf32>
    %c0_10 = arith.constant 0 : index
    %c0_11 = arith.constant 0 : index
    %c0_12 = arith.constant 0 : index
    %12 = vector.load %arg5[%c0_10, %c0_11, %c0_12] : memref<1x1x128xf32, #tpu.memory_space<vmem>>, vector<1x1x128xf32>
    tpu.vector_store %arg5[%c0_10, %c0_11, %c0_12], %11 {strides = array<i32>} : memref<1x1x128xf32, #tpu.memory_space<vmem>>, vector<1x1x128xf32>,
    return
  }
  func.func @transform_0(%arg0: i32) -> (i32, i32) {
    %c0_i32 = arith.constant 0 : i32
    %c0_i32_0 = arith.constant 0 : i32
    return %arg0, %c0_i32 : i32, i32
  }
  func.func @transform_1(%arg0: i32) -> (i32, i32) {
    %c0_i32 = arith.constant 0 : i32
    %c0_i32_0 = arith.constant 0 : i32
    %c0_i32_1 = arith.constant 0 : i32
    return %c0_i32, %c0_i32_0 : i32, i32
  }
  func.func @transform_2(%arg0: i32) -> (i32, i32) {
    %c0_i32 = arith.constant 0 : i32
    %c0_i32_0 = arith.constant 0 : i32
    return %arg0, %c0_i32 : i32, i32
  }
  func.func @transform_3(%arg0: i32) -> (i32, i32, i32) {
    %c0_i32 = arith.constant 0 : i32
    %c0_i32_0 = arith.constant 0 : i32
    %c0_i32_1 = arith.constant 0 : i32
    return %arg0, %c0_i32, %c0_i32_0 : i32, i32, i32
  }
  func.func @transform_4(%arg0: i32) -> (i32, i32, i32) {
    %c0_i32 = arith.constant 0 : i32
    %c0_i32_0 = arith.constant 0 : i32
    %c0_i32_1 = arith.constant 0 : i32
    return %arg0, %c0_i32, %c0_i32_0 : i32, i32, i32
  }
}

</mosaic_0001>

<bundles_post_ra>
// kernel: tpu_custom_call.1
= control target key start
LH: loop header
LB: loop body
LE: loop exit
PB: predicated region body
PF: predicated region fallthrough
CT: control target
= control target key end

     0   :  { %10 = vsyncpa [#allocation3], 0  ;;  %s1183_s0 = inlined_call_operand.hbm [shape: f32[512,128], index: 0, kind: input, shape index: {}]   ;;  %s1184_s1 = inlined_call_operand.hbm [shape: f32[128,128], index: 1, kind: input, shape index: {}]   ;;  %s1185_s2 = inlined_call_operand.hbm [shape: f32[512,128], index: 2, kind: output, shape index: {0}]   ;;  %s1186_s3 = inlined_call_operand.hbm [shape: f32[1,1,128], index: 3, kind: output, shape index: {1}]   ;;  %s1187_s4 = inlined_call_operand.hbm [shape: f32[1,1,128], index: 4, kind: output, shape index: {2}]  }
   0x1   :  { %11 = vsyncpa [#allocation6], 0 }
   0x2   :  { %12 = vsyncpa [#allocation4], 0 }
   0x3   :  { %13 = vsyncpa [#allocation9], 0  ;;  %s18_s17 = sshll.u32 %s1183_s0, 4  ;;  %s839_s18 = smov [#allocation2]   ;;  %s19_s17 = int_to_ptr.hbm [resolvable:$true] %s18_s17 }
   0x4   :  { %s20_s19 = sshll.u32 %s839_s18, 4  ;;  %s31_s22 = sshll.u32 %s1184_s1, 4  ;;  %s21_s19 = int_to_ptr.vmem [resolvable:$true] %s20_s19  ;;  %s32_s22 = int_to_ptr.hbm [resolvable:$true] %s31_s22 }
   0x5   :  { %s840_s23 = smov 128   ;;  %s841_s24 = smov 8  }
   0x6   :  { %26 = dma.hbm_to_vmem [thread:$0]  %s19_s17, 8192, %s21_s19, [#allocation3], %s840_s23, %s840_s23, %s841_s24  }
   0x7   :  { %s842_s25 = smov [#allocation5]  }
   0x8   :  { %s33_s26 = sshll.u32 %s842_s25, 4  ;;  %s34_s26 = int_to_ptr.vmem [resolvable:$true] %s33_s26 }
   0x9   :  { %39 = dma.hbm_to_vmem [thread:$0]  %s32_s22, 2048, %s34_s26, [#allocation6], %s840_s23, %s840_s23, %s841_s24  }
   0xa   :  { %831 = dma.done.wait [#allocation3], 8192  }
   0xb   :  { %832 = vsyncadd [#allocation3], 4294959104 }
   0xc   :  { %833 = dma.done.wait [#allocation6], 2048  }
   0xd   :  { %834 = vsyncadd [#allocation6], 4294965248  ;;  %v127_v0 = vld [vmem:[#allocation5 + $0x78] sm:$0xff]  ;;  %v126_v1 = vld [vmem:[#allocation5 + $0x70] sm:$0xff]  ;;  %s843_s0 = smov [#allocation7]   ;;  %s611_s29 = sshll.u32 %s1185_s2, 4  ;;  %s612_s29 = int_to_ptr.hbm [resolvable:$true] %s611_s29 }
   0xe   :  { %128 = vmatpush.msra.mxu0 %v127_v0  ;;  %656 = vmatpush.msra.mxu1 %v127_v0  ;;  %v125_v2 = vld [vmem:[#allocation5 + $0x68] sm:$0xff]  ;;  %v124_v3 = vld [vmem:[#allocation5 + $0x60] sm:$0xff]  ;;  %v123_v4 = vld [vmem:[#allocation5 + $0x58] sm:$0xff]  ;;  %s609_s1 = sshll.u32 %s843_s0, 4  ;;  %s844_s2 = smov [#allocation8]   ;;  %s610_s1 = int_to_ptr.vmem [resolvable:$true] %s609_s1 }
   0xf   :  { %657 = vmatpush.msra.mxu2 %v127_v0  ;;  %658 = vmatpush.msra.mxu3 %v127_v0  ;;  %v122_v5 = vld [vmem:[#allocation5 + $0x50] sm:$0xff]  ;;  %v121_v6 = vld [vmem:[#allocation5 + $0x48] sm:$0xff]  ;;  %v120_v7 = vld [vmem:[#allocation5 + $0x40] sm:$0xff]  ;;  %s623_s30 = sshll.u32 %s844_s2, 4  ;;  %s625_s7 = sshll.u32 %s1186_s3, 4  ;;  %s624_s30 = int_to_ptr.vmem [resolvable:$true] %s623_s30  ;;  %s626_s7 = int_to_ptr.hbm [resolvable:$true] %s625_s7 }
  0x10   :  { %129 = vmatpush.msra.mxu0 %v126_v1  ;;  %659 = vmatpush.msra.mxu1 %v126_v1  ;;  %v119_v8 = vld [vmem:[#allocation5 + $0x38] sm:$0xff]  ;;  %v118_v9 = vld [vmem:[#allocation5 + $0x30] sm:$0xff]  ;;  %v117_v10 = vld [vmem:[#allocation5 + $0x28] sm:$0xff]  ;;  %s845_s8 = smov [#allocation10]   ;;  %s636_s12 = sshll.u32 %s1187_s4, 4  ;;  %s637_s12 = int_to_ptr.hbm [resolvable:$true] %s636_s12 }
  0x11   :  { %660 = vmatpush.msra.mxu2 %v126_v1  ;;  %661 = vmatpush.msra.mxu3 %v126_v1  ;;  %v116_v11 = vld [vmem:[#allocation5 + $0x20] sm:$0xff]  ;;  %v115_v12 = vld [vmem:[#allocation5 + $0x18] sm:$0xff]  ;;  %v114_v13 = vld [vmem:[#allocation5 + $0x10] sm:$0xff]  ;;  %s634_s9 = sshll.u32 %s845_s8, 4  ;;  %s635_s9 = int_to_ptr.vmem [resolvable:$true] %s634_s9 }
  0x12   :  { %130 = vmatpush.msra.mxu0 %v125_v2  ;;  %662 = vmatpush.msra.mxu1 %v125_v2  ;;  %v113_v14 = vld [vmem:[#allocation5 + $0x8] sm:$0xff]  ;;  %v112_v15 = vld [vmem:[#allocation5] sm:$0xff]  ;;  %v50_v20 = vld [vmem:[#allocation2 + $0x10] sm:$0xff] }
  0x13   :  { %663 = vmatpush.msra.mxu2 %v125_v2  ;;  %664 = vmatpush.msra.mxu3 %v125_v2  ;;  %v48_v16 = vld [vmem:[#allocation2] sm:$0xff]  ;;  %v49_v18 = vld [vmem:[#allocation2 + $0x8] sm:$0xff]  ;;  %v66_v21 = vld [vmem:[#allocation2 + $0x90] sm:$0xff] }
  0x14   :  { %131 = vmatpush.msra.mxu0 %v124_v3  ;;  %665 = vmatpush.msra.mxu1 %v124_v3  ;;  %v64_v17 = vld [vmem:[#allocation2 + $0x80] sm:$0xff]  ;;  %v65_v19 = vld [vmem:[#allocation2 + $0x88] sm:$0xff]  ;;  %v51_v22 = vld [vmem:[#allocation2 + $0x18] sm:$0xff] }
  0x15   :  { %666 = vmatpush.msra.mxu2 %v124_v3  ;;  %667 = vmatpush.msra.mxu3 %v124_v3  ;;  %v67_v23 = vld [vmem:[#allocation2 + $0x98] sm:$0xff]  ;;  %v80_v24 = vld [vmem:[#allocation2 + $0x100] sm:$0xff]  ;;  %v81_v27 = vld [vmem:[#allocation2 + $0x108] sm:$0xff] }
  0x16   :  { %132 = vmatpush.msra.mxu0 %v123_v4  ;;  %668 = vmatpush.msra.mxu1 %v123_v4  ;;  %v52_v25 = vld [vmem:[#allocation2 + $0x20] sm:$0xff]  ;;  %v53_v28 = vld [vmem:[#allocation2 + $0x28] sm:$0xff]  ;;  %v82_v30 = vld [vmem:[#allocation2 + $0x110] sm:$0xff] }
  0x17   :  { %669 = vmatpush.msra.mxu2 %v123_v4  ;;  %670 = vmatpush.msra.mxu3 %v123_v4  ;;  %v68_v26 = vld [vmem:[#allocation2 + $0xa0] sm:$0xff]  ;;  %v69_v29 = vld [vmem:[#allocation2 + $0xa8] sm:$0xff]  ;;  %v54_v31 = vld [vmem:[#allocation2 + $0x30] sm:$0xff] }
  0x18   :  { %133 = vmatpush.msra.mxu0 %v122_v5  ;;  %671 = vmatpush.msra.mxu1 %v122_v5  ;;  %v70_v32 = vld [vmem:[#allocation2 + $0xb0] sm:$0xff]  ;;  %v83_v33 = vld [vmem:[#allocation2 + $0x118] sm:$0xff]  ;;  %v84_v36 = vld [vmem:[#allocation2 + $0x120] sm:$0xff] }
  0x19   :  { %672 = vmatpush.msra.mxu2 %v122_v5  ;;  %673 = vmatpush.msra.mxu3 %v122_v5  ;;  %v55_v34 = vld [vmem:[#allocation2 + $0x38] sm:$0xff]  ;;  %v96_v37 = vld [vmem:[#allocation2 + $0x180] sm:$0xff]  ;;  %v85_v40 = vld [vmem:[#allocation2 + $0x128] sm:$0xff] }
  0x1a   :  { %134 = vmatpush.msra.mxu0 %v121_v6  ;;  %674 = vmatpush.msra.mxu1 %v121_v6  ;;  %v71_v35 = vld [vmem:[#allocation2 + $0xb8] sm:$0xff]  ;;  %v56_v38 = vld [vmem:[#allocation2 + $0x40] sm:$0xff]  ;;  %v97_v41 = vld [vmem:[#allocation2 + $0x188] sm:$0xff] }
  0x1b   :  { %675 = vmatpush.msra.mxu2 %v121_v6  ;;  %676 = vmatpush.msra.mxu3 %v121_v6  ;;  %v72_v39 = vld [vmem:[#allocation2 + $0xc0] sm:$0xff]  ;;  %v57_v42 = vld [vmem:[#allocation2 + $0x48] sm:$0xff]  ;;  %v86_v44 = vld [vmem:[#allocation2 + $0x130] sm:$0xff] }
  0x1c   :  { %135 = vmatpush.msra.mxu0 %v120_v7  ;;  %677 = vmatpush.msra.mxu1 %v120_v7  ;;  %v73_v43 = vld [vmem:[#allocation2 + $0xc8] sm:$0xff]  ;;  %v98_v45 = vld [vmem:[#allocation2 + $0x190] sm:$0xff]  ;;  %v87_v48 = vld [vmem:[#allocation2 + $0x138] sm:$0xff] }
  0x1d   :  { %678 = vmatpush.msra.mxu2 %v120_v7  ;;  %679 = vmatpush.msra.mxu3 %v120_v7  ;;  %v58_v46 = vld [vmem:[#allocation2 + $0x50] sm:$0xff]  ;;  %v99_v49 = vld [vmem:[#allocation2 + $0x198] sm:$0xff]  ;;  %v88_v52 = vld [vmem:[#allocation2 + $0x140] sm:$0xff] }
  0x1e   :  { %136 = vmatpush.msra.mxu0 %v119_v8  ;;  %680 = vmatpush.msra.mxu1 %v119_v8  ;;  %v74_v47 = vld [vmem:[#allocation2 + $0xd0] sm:$0xff]  ;;  %v59_v50 = vld [vmem:[#allocation2 + $0x58] sm:$0xff]  ;;  %v100_v53 = vld [vmem:[#allocation2 + $0x1a0] sm:$0xff] }
  0x1f   :  { %681 = vmatpush.msra.mxu2 %v119_v8  ;;  %682 = vmatpush.msra.mxu3 %v119_v8  ;;  %v75_v51 = vld [vmem:[#allocation2 + $0xd8] sm:$0xff]  ;;  %v60_v54 = vld [vmem:[#allocation2 + $0x60] sm:$0xff]  ;;  %v89_v56 = vld [vmem:[#allocation2 + $0x148] sm:$0xff] }
  0x20   :  { %137 = vmatpush.msra.mxu0 %v118_v9  ;;  %683 = vmatpush.msra.mxu1 %v118_v9  ;;  %v76_v55 = vld [vmem:[#allocation2 + $0xe0] sm:$0xff]  ;;  %v101_v57 = vld [vmem:[#allocation2 + $0x1a8] sm:$0xff]  ;;  %v90_v60 = vld [vmem:[#allocation2 + $0x150] sm:$0xff] }
  0x21   :  { %684 = vmatpush.msra.mxu2 %v118_v9  ;;  %685 = vmatpush.msra.mxu3 %v118_v9  ;;  %v61_v58 = vld [vmem:[#allocation2 + $0x68] sm:$0xff]  ;;  %v102_v61 = vld [vmem:[#allocation2 + $0x1b0] sm:$0xff]  ;;  %v91_v0 = vld [vmem:[#allocation2 + $0x158] sm:$0xff] }
  0x22   :  { %138 = vmatpush.msra.mxu0 %v117_v10  ;;  %686 = vmatpush.msra.mxu1 %v117_v10  ;;  %v77_v59 = vld [vmem:[#allocation2 + $0xe8] sm:$0xff]  ;;  %v62_v62 = vld [vmem:[#allocation2 + $0x70] sm:$0xff]  ;;  %v103_v1 = vld [vmem:[#allocation2 + $0x1b8] sm:$0xff] }
  0x23   :  { %687 = vmatpush.msra.mxu2 %v117_v10  ;;  %688 = vmatpush.msra.mxu3 %v117_v10  ;;  %v78_v63 = vld [vmem:[#allocation2 + $0xf0] sm:$0xff]  ;;  %v63_v2 = vld [vmem:[#allocation2 + $0x78] sm:$0xff]  ;;  %v92_v4 = vld [vmem:[#allocation2 + $0x160] sm:$0xff] }
  0x24   :  { %139 = vmatpush.msra.mxu0 %v116_v11  ;;  %689 = vmatpush.msra.mxu1 %v116_v11  ;;  %v79_v3 = vld [vmem:[#allocation2 + $0xf8] sm:$0xff]  ;;  %v104_v5 = vld [vmem:[#allocation2 + $0x1c0] sm:$0xff]  ;;  %v93_v8 = vld [vmem:[#allocation2 + $0x168] sm:$0xff] }
  0x25   :  { %690 = vmatpush.msra.mxu2 %v116_v11  ;;  %691 = vmatpush.msra.mxu3 %v116_v11  ;;  %v105_v9 = vld [vmem:[#allocation2 + $0x1c8] sm:$0xff] }
  0x26   :  { %140 = vmatpush.msra.mxu0 %v115_v12  ;;  %692 = vmatpush.msra.mxu1 %v115_v12 }
  0x27   :  { %693 = vmatpush.msra.mxu2 %v115_v12  ;;  %694 = vmatpush.msra.mxu3 %v115_v12 }
  0x28   :  { %141 = vmatpush.msra.mxu0 %v114_v13  ;;  %695 = vmatpush.msra.mxu1 %v114_v13 }
  0x29   :  { %696 = vmatpush.msra.mxu2 %v114_v13  ;;  %697 = vmatpush.msra.mxu3 %v114_v13 }
  0x2a   :  { %142 = vmatpush.msra.mxu0 %v113_v14  ;;  %698 = vmatpush.msra.mxu1 %v113_v14 }
  0x2b   :  { %699 = vmatpush.msra.mxu2 %v113_v14  ;;  %700 = vmatpush.msra.mxu3 %v113_v14 }
  0x2c   :  { %143 = vmatpush.msra.mxu0 %v112_v15  ;;  %701 = vmatpush.msra.mxu1 %v112_v15 }
  0x2d   :  { %144 = vmatmul.f32.vlgmr.msra.gmra.mxu0 %v48_v16  ;;  %192 = vmatmul.f32.vlgmr.msra.gmra.mxu1 %v64_v17  ;;  %v94_v16 = vld [vmem:[#allocation2 + $0x170] sm:$0xff] }
  0x2e   :  { %702 = vmatpush.msra.mxu2 %v112_v15  ;;  %703 = vmatpush.msra.mxu3 %v112_v15  ;;  %v106_v17 = vld [vmem:[#allocation2 + $0x1d0] sm:$0xff] }
  0x2f   :  { %240 = vmatmul.f32.vlgmr.msra.gmra.mxu2 %v80_v24  ;;  %288 = vmatmul.f32.vlgmr.msra.gmra.mxu3 %v96_v37  ;;  %v107_v24 = vld [vmem:[#allocation2 + $0x1d8] sm:$0xff]  ;;  %v109_v37 = vld [vmem:[#allocation2 + $0x1e8] sm:$0xff] }
  0x35   :  { %147 = vmatmul.f32.gmra.mxu0 %v49_v18  ;;  %195 = vmatmul.f32.gmra.mxu1 %v65_v19 }
  0x37   :  { %243 = vmatmul.f32.gmra.mxu2 %v81_v27  ;;  %291 = vmatmul.f32.gmra.mxu3 %v97_v41  ;;  %v110_v41 = vld [vmem:[#allocation2 + $0x1f0] sm:$0xff] }
  0x3d   :  { %150 = vmatmul.f32.gmra.mxu0 %v50_v20  ;;  %198 = vmatmul.f32.gmra.mxu1 %v66_v21 }
  0x3f   :  { %246 = vmatmul.f32.gmra.mxu2 %v82_v30  ;;  %294 = vmatmul.f32.gmra.mxu3 %v98_v45  ;;  %v108_v30 = vld [vmem:[#allocation2 + $0x1e0] sm:$0xff]  ;;  %v111_v45 = vld [vmem:[#allocation2 + $0x1f8] sm:$0xff] }
  0x45   :  { %153 = vmatmul.f32.gmra.mxu0 %v51_v22  ;;  %201 = vmatmul.f32.gmra.mxu1 %v67_v23  ;;  %v95_v23 = vld [vmem:[#allocation2 + $0x178] sm:$0xff] }
  0x47   :  { %249 = vmatmul.f32.gmra.mxu2 %v83_v33  ;;  %297 = vmatmul.f32.gmra.mxu3 %v99_v49 }
  0x4d   :  { %156 = vmatmul.f32.gmra.mxu0 %v52_v25  ;;  %204 = vmatmul.f32.gmra.mxu1 %v68_v26 }
  0x4f   :  { %252 = vmatmul.f32.gmra.mxu2 %v84_v36  ;;  %300 = vmatmul.f32.gmra.mxu3 %v100_v53 }
  0x55   :  { %159 = vmatmul.f32.gmra.mxu0 %v53_v28  ;;  %207 = vmatmul.f32.gmra.mxu1 %v69_v29 }
  0x57   :  { %255 = vmatmul.f32.gmra.mxu2 %v85_v40  ;;  %303 = vmatmul.f32.gmra.mxu3 %v101_v57 }
  0x5d   :  { %162 = vmatmul.f32.gmra.mxu0 %v54_v31  ;;  %210 = vmatmul.f32.gmra.mxu1 %v70_v32 }
  0x5f   :  { %258 = vmatmul.f32.gmra.mxu2 %v86_v44  ;;  %306 = vmatmul.f32.gmra.mxu3 %v102_v61 }
  0x65   :  { %165 = vmatmul.f32.gmra.mxu0 %v55_v34  ;;  %213 = vmatmul.f32.gmra.mxu1 %v71_v35 }
  0x67   :  { %261 = vmatmul.f32.gmra.mxu2 %v87_v48  ;;  %309 = vmatmul.f32.gmra.mxu3 %v103_v1 }
  0x6d   :  { %168 = vmatmul.f32.gmra.mxu0 %v56_v38  ;;  %216 = vmatmul.f32.gmra.mxu1 %v72_v39 }
  0x6f   :  { %264 = vmatmul.f32.gmra.mxu2 %v88_v52  ;;  %312 = vmatmul.f32.gmra.mxu3 %v104_v5 }
  0x75   :  { %171 = vmatmul.f32.gmra.mxu0 %v57_v42  ;;  %219 = vmatmul.f32.gmra.mxu1 %v73_v43 }
  0x77   :  { %267 = vmatmul.f32.gmra.mxu2 %v89_v56  ;;  %315 = vmatmul.f32.gmra.mxu3 %v105_v9 }
  0x7d   :  { %174 = vmatmul.f32.gmra.mxu0 %v58_v46  ;;  %222 = vmatmul.f32.gmra.mxu1 %v74_v47 }
  0x7f   :  { %270 = vmatmul.f32.gmra.mxu2 %v90_v60  ;;  %318 = vmatmul.f32.gmra.mxu3 %v106_v17 }
  0x85   :  { %177 = vmatmul.f32.gmra.mxu0 %v59_v50  ;;  %225 = vmatmul.f32.gmra.mxu1 %v75_v51 }
  0x87   :  { %273 = vmatmul.f32.gmra.mxu2 %v91_v0  ;;  %321 = vmatmul.f32.gmra.mxu3 %v107_v24 }
  0x8d   :  { %180 = vmatmul.f32.gmra.mxu0 %v60_v54  ;;  %228 = vmatmul.f32.gmra.mxu1 %v76_v55 }
  0x8f   :  { %276 = vmatmul.f32.gmra.mxu2 %v92_v4  ;;  %324 = vmatmul.f32.gmra.mxu3 %v108_v30 }
  0x95   :  { %183 = vmatmul.f32.gmra.mxu0 %v61_v58  ;;  %231 = vmatmul.f32.gmra.mxu1 %v77_v59 }
  0x97   :  { %279 = vmatmul.f32.gmra.mxu2 %v93_v8  ;;  %327 = vmatmul.f32.gmra.mxu3 %v109_v37 }
  0x9d   :  { %186 = vmatmul.f32.gmra.mxu0 %v62_v62  ;;  %234 = vmatmul.f32.gmra.mxu1 %v78_v63 }
  0x9f   :  { %282 = vmatmul.f32.gmra.mxu2 %v94_v16  ;;  %330 = vmatmul.f32.gmra.mxu3 %v110_v41 }
  0xa5   :  { %189 = vmatmul.f32.gmra.mxu0 %v63_v2  ;;  %237 = vmatmul.f32.gmra.mxu1 %v79_v3 }
  0xa7   :  { %285 = vmatmul.f32.gmra.mxu2 %v95_v23  ;;  %333 = vmatmul.f32.gmra.mxu3 %v111_v45 }
  0xaa   :  { %v145_v6 = vpop.f32.mrf.mxu0  ;;  %v883_v7 = vpop.f32.mrf.mxu1 }
  0xab   :  { %337 = vst [vmem:[#allocation7] sm:$0xff] %v145_v6  ;;  %v471_v12 = vmul.f32 %v145_v6, %v145_v6 }
  0xac   :  { %353 = vst [vmem:[#allocation7 + $0x80] sm:$0xff] %v883_v7 }
  0xb2   :  { %v148_v10 = vpop.f32.mrf.mxu0  ;;  %v886_v11 = vpop.f32.mrf.mxu1 }
  0xb3   :  { %338 = vst [vmem:[#allocation7 + $0x8] sm:$0xff] %v148_v10  ;;  %v401_v13 = vadd.f32 %v148_v10, %v145_v6  ;;  %v472_v14 = vmul.f32 %v148_v10, %v148_v10  ;;  %v899_v35 = vpop.f32.mrf.mxu2  ;;  %v930_v52 = vpop.f32.mrf.mxu3 }
  0xb4   :  { %354 = vst [vmem:[#allocation7 + $0x88] sm:$0xff] %v886_v11 }
  0xb5   :  { %v535_v15 = vadd.f32 %v472_v14, %v471_v12  ;;  %369 = vst [vmem:[#allocation7 + $0x100] sm:$0xff] %v899_v35 }
  0xb6   :  { %385 = vst [vmem:[#allocation7 + $0x180] sm:$0xff] %v930_v52 }
  0xba   :  { %v151_v18 = vpop.f32.mrf.mxu0  ;;  %v889_v19 = vpop.f32.mrf.mxu1 }
  0xbb   :  { %339 = vst [vmem:[#allocation7 + $0x10] sm:$0xff] %v151_v18  ;;  %v402_v20 = vadd.f32 %v401_v13, %v151_v18  ;;  %v473_v21 = vmul.f32 %v151_v18, %v151_v18  ;;  %v910_v40 = vpop.f32.mrf.mxu2  ;;  %v939_v56 = vpop.f32.mrf.mxu3 }
  0xbc   :  { %355 = vst [vmem:[#allocation7 + $0x90] sm:$0xff] %v889_v19 }
  0xbd   :  { %v536_v22 = vadd.f32 %v535_v15, %v473_v21  ;;  %370 = vst [vmem:[#allocation7 + $0x108] sm:$0xff] %v910_v40 }
  0xbe   :  { %386 = vst [vmem:[#allocation7 + $0x188] sm:$0xff] %v939_v56 }
  0xc2   :  { %v154_v25 = vpop.f32.mrf.mxu0  ;;  %v892_v26 = vpop.f32.mrf.mxu1 }
  0xc3   :  { %340 = vst [vmem:[#allocation7 + $0x18] sm:$0xff] %v154_v25  ;;  %v403_v27 = vadd.f32 %v402_v20, %v154_v25  ;;  %v474_v28 = vmul.f32 %v154_v25, %v154_v25  ;;  %v916_v44 = vpop.f32.mrf.mxu2  ;;  %v948_v60 = vpop.f32.mrf.mxu3 }
  0xc4   :  { %356 = vst [vmem:[#allocation7 + $0x98] sm:$0xff] %v892_v26 }
  0xc5   :  { %v537_v29 = vadd.f32 %v536_v22, %v474_v28  ;;  %371 = vst [vmem:[#allocation7 + $0x110] sm:$0xff] %v916_v44 }
  0xc6   :  { %387 = vst [vmem:[#allocation7 + $0x190] sm:$0xff] %v948_v60 }
  0xca   :  { %v157_v31 = vpop.f32.mrf.mxu0  ;;  %v895_v32 = vpop.f32.mrf.mxu1 }
  0xcb   :  { %341 = vst [vmem:[#allocation7 + $0x20] sm:$0xff] %v157_v31  ;;  %v897_v33 = vadd.f32 %v403_v27, %v157_v31  ;;  %v475_v34 = vmul.f32 %v157_v31, %v157_v31  ;;  %v922_v48 = vpop.f32.mrf.mxu2  ;;  %v957_v0 = vpop.f32.mrf.mxu3 }
  0xcc   :  { %357 = vst [vmem:[#allocation7 + $0xa0] sm:$0xff] %v895_v32 }
  0xcd   :  { %v902_v36 = vadd.f32 %v537_v29, %v475_v34  ;;  %372 = vst [vmem:[#allocation7 + $0x118] sm:$0xff] %v922_v48 }
  0xce   :  { %388 = vst [vmem:[#allocation7 + $0x198] sm:$0xff] %v957_v0 }
  0xd2   :  { %v905_v38 = vpop.f32.mrf.mxu0  ;;  %v907_v39 = vpop.f32.mrf.mxu1 }
  0xd3   :  { %342 = vst [vmem:[#allocation7 + $0x28] sm:$0xff] %v905_v38  ;;  %v928_v51 = vpop.f32.mrf.mxu2  ;;  %v966_v4 = vpop.f32.mrf.mxu3  ;;  %v476_v5 = vmul.f32 %v905_v38, %v905_v38  ;;  %v405_v6 = vadd.f32 %v897_v33, %v905_v38 }
  0xd4   :  { %358 = vst [vmem:[#allocation7 + $0xa8] sm:$0xff] %v907_v39 }
  0xd5   :  { %373 = vst [vmem:[#allocation7 + $0x120] sm:$0xff] %v928_v51  ;;  %v539_v9 = vadd.f32 %v902_v36, %v476_v5 }
  0xd6   :  { %389 = vst [vmem:[#allocation7 + $0x1a0] sm:$0xff] %v966_v4 }
  0xda   :  { %v163_v42 = vpop.f32.mrf.mxu0  ;;  %v914_v43 = vpop.f32.mrf.mxu1 }
  0xdb   :  { %343 = vst [vmem:[#allocation7 + $0x30] sm:$0xff] %v163_v42  ;;  %v937_v55 = vpop.f32.mrf.mxu2  ;;  %v477_v8 = vmul.f32 %v163_v42, %v163_v42  ;;  %v406_v10 = vadd.f32 %v405_v6, %v163_v42  ;;  %v980_v20 = vpop.f32.mrf.mxu3 }
  0xdc   :  { %359 = vst [vmem:[#allocation7 + $0xb0] sm:$0xff] %v914_v43 }
  0xdd   :  { %374 = vst [vmem:[#allocation7 + $0x128] sm:$0xff] %v937_v55  ;;  %v540_v15 = vadd.f32 %v539_v9, %v477_v8 }
  0xde   :  { %390 = vst [vmem:[#allocation7 + $0x1a8] sm:$0xff] %v980_v20 }
  0xe2   :  { %v166_v46 = vpop.f32.mrf.mxu0  ;;  %v920_v47 = vpop.f32.mrf.mxu1 }
  0xe3   :  { %344 = vst [vmem:[#allocation7 + $0x38] sm:$0xff] %v166_v46  ;;  %v946_v59 = vpop.f32.mrf.mxu2  ;;  %v478_v12 = vmul.f32 %v166_v46, %v166_v46  ;;  %v407_v16 = vadd.f32 %v406_v10, %v166_v46  ;;  %v989_v41 = vpop.f32.mrf.mxu3 }
  0xe4   :  { %360 = vst [vmem:[#allocation7 + $0xb8] sm:$0xff] %v920_v47 }
  0xe5   :  { %375 = vst [vmem:[#allocation7 + $0x130] sm:$0xff] %v946_v59  ;;  %v541_v21 = vadd.f32 %v540_v15, %v478_v12 }
  0xe6   :  { %391 = vst [vmem:[#allocation7 + $0x1b0] sm:$0xff] %v989_v41 }
  0xea   :  { %v169_v49 = vpop.f32.mrf.mxu0  ;;  %v926_v50 = vpop.f32.mrf.mxu1 }
  0xeb   :  { %345 = vst [vmem:[#allocation7 + $0x40] sm:$0xff] %v169_v49  ;;  %v955_v63 = vpop.f32.mrf.mxu2  ;;  %v479_v17 = vmul.f32 %v169_v49, %v169_v49  ;;  %v408_v22 = vadd.f32 %v407_v16, %v169_v49  ;;  %v487_v16 = vmul.f32 %v883_v7, %v883_v7 }
  0xec   :  { %361 = vst [vmem:[#allocation7 + $0xc0] sm:$0xff] %v926_v50 }
  0xed   :  { %376 = vst [vmem:[#allocation7 + $0x138] sm:$0xff] %v955_v63  ;;  %v542_v24 = vadd.f32 %v541_v21, %v479_v17  ;;  %v488_v21 = vmul.f32 %v886_v11, %v886_v11 }
  0xf2   :  { %v172_v53 = vpop.f32.mrf.mxu0  ;;  %v935_v54 = vpop.f32.mrf.mxu1 }
  0xf3   :  { %346 = vst [vmem:[#allocation7 + $0x48] sm:$0xff] %v172_v53  ;;  %v964_v3 = vpop.f32.mrf.mxu2  ;;  %v480_v23 = vmul.f32 %v172_v53, %v172_v53  ;;  %v409_v25 = vadd.f32 %v408_v22, %v172_v53 }
  0xf4   :  { %362 = vst [vmem:[#allocation7 + $0xc8] sm:$0xff] %v935_v54 }
  0xf5   :  { %377 = vst [vmem:[#allocation7 + $0x140] sm:$0xff] %v964_v3  ;;  %v543_v28 = vadd.f32 %v542_v24, %v480_v23  ;;  %v489_v24 = vmul.f32 %v889_v19, %v889_v19 }
  0xfa   :  { %v175_v57 = vpop.f32.mrf.mxu0  ;;  %v944_v58 = vpop.f32.mrf.mxu1 }
  0xfb   :  { %347 = vst [vmem:[#allocation7 + $0x50] sm:$0xff] %v175_v57  ;;  %v978_v18 = vpop.f32.mrf.mxu2  ;;  %v481_v27 = vmul.f32 %v175_v57, %v175_v57  ;;  %v410_v29 = vadd.f32 %v409_v25, %v175_v57 }
  0xfc   :  { %363 = vst [vmem:[#allocation7 + $0xd0] sm:$0xff] %v944_v58 }
  0xfd   :  { %378 = vst [vmem:[#allocation7 + $0x148] sm:$0xff] %v978_v18  ;;  %v544_v34 = vadd.f32 %v543_v28, %v481_v27 }
 0x102   :  { %v178_v61 = vpop.f32.mrf.mxu0  ;;  %v953_v62 = vpop.f32.mrf.mxu1 }
 0x103   :  { %348 = vst [vmem:[#allocation7 + $0x58] sm:$0xff] %v178_v61  ;;  %v482_v30 = vmul.f32 %v178_v61, %v178_v61  ;;  %v411_v36 = vadd.f32 %v410_v29, %v178_v61  ;;  %v987_v38 = vpop.f32.mrf.mxu2 }
 0x104   :  { %364 = vst [vmem:[#allocation7 + $0xd8] sm:$0xff] %v953_v62 }
 0x105   :  { %v545_v42 = vadd.f32 %v544_v34, %v482_v30  ;;  %379 = vst [vmem:[#allocation7 + $0x150] sm:$0xff] %v987_v38 }
 0x10a   :  { %v181_v1 = vpop.f32.mrf.mxu0  ;;  %v962_v2 = vpop.f32.mrf.mxu1 }
 0x10b   :  { %349 = vst [vmem:[#allocation7 + $0x60] sm:$0xff] %v181_v1  ;;  %v483_v37 = vmul.f32 %v181_v1, %v181_v1  ;;  %v412_v45 = vadd.f32 %v411_v36, %v181_v1  ;;  %v996_v15 = vpop.f32.mrf.mxu2  ;;  %v998_v1 = vpop.f32.mrf.mxu3 }
 0x10c   :  { %365 = vst [vmem:[#allocation7 + $0xe0] sm:$0xff] %v962_v2 }
 0x10d   :  { %v546_v49 = vadd.f32 %v545_v42, %v483_v37  ;;  %380 = vst [vmem:[#allocation7 + $0x158] sm:$0xff] %v996_v15  ;;  %v493_v42 = vmul.f32 %v914_v43, %v914_v43 }
 0x10e   :  { %392 = vst [vmem:[#allocation7 + $0x1b8] sm:$0xff] %v998_v1 }
 0x112   :  { %v184_v13 = vpop.f32.mrf.mxu0  ;;  %v976_v14 = vpop.f32.mrf.mxu1 }
 0x113   :  { %350 = vst [vmem:[#allocation7 + $0x68] sm:$0xff] %v184_v13  ;;  %v484_v46 = vmul.f32 %v184_v13, %v184_v13  ;;  %v413_v53 = vadd.f32 %v412_v45, %v184_v13  ;;  %v1015_v30 = vpop.f32.mrf.mxu2 }
 0x114   :  { %366 = vst [vmem:[#allocation7 + $0xe8] sm:$0xff] %v976_v14 }
 0x115   :  { %v547_v5 = vadd.f32 %v546_v49, %v484_v46  ;;  %381 = vst [vmem:[#allocation7 + $0x160] sm:$0xff] %v1015_v30  ;;  %v494_v49 = vmul.f32 %v920_v47, %v920_v47 }
 0x11a   :  { %v187_v31 = vpop.f32.mrf.mxu0  ;;  %v985_v33 = vpop.f32.mrf.mxu1 }
 0x11b   :  { %351 = vst [vmem:[#allocation7 + $0x70] sm:$0xff] %v187_v31  ;;  %v485_v57 = vmul.f32 %v187_v31, %v187_v31  ;;  %v414_v61 = vadd.f32 %v413_v53, %v187_v31  ;;  %v1017_v31 = vpop.f32.mrf.mxu3 }
 0x11c   :  { %367 = vst [vmem:[#allocation7 + $0xf0] sm:$0xff] %v985_v33 }
 0x11d   :  { %v548_v9 = vadd.f32 %v547_v5, %v485_v57  ;;  %393 = vst [vmem:[#allocation7 + $0x1c0] sm:$0xff] %v1017_v31  ;;  %v1033_v57 = vpop.f32.mrf.mxu2 }
 0x11e   :  { %382 = vst [vmem:[#allocation7 + $0x168] sm:$0xff] %v1033_v57 }
 0x122   :  { %v190_v6 = vpop.f32.mrf.mxu0  ;;  %v994_v8 = vpop.f32.mrf.mxu1 }
 0x123   :  { %352 = vst [vmem:[#allocation7 + $0x78] sm:$0xff] %v190_v6  ;;  %v415_v10 = vadd.f32 %v414_v61, %v190_v6  ;;  %v486_v12 = vmul.f32 %v190_v6, %v190_v6  ;;  %v1035_v5 = vpop.f32.mrf.mxu3 }
 0x124   :  { %368 = vst [vmem:[#allocation7 + $0xf8] sm:$0xff] %v994_v8 }
 0x125   :  { %v416_v13 = vadd.f32 %v415_v10, %v883_v7  ;;  %v549_v17 = vadd.f32 %v548_v9, %v486_v12  ;;  %v490_v7 = vmul.f32 %v892_v26, %v892_v26  ;;  %394 = vst [vmem:[#allocation7 + $0x1c8] sm:$0xff] %v1035_v5  ;;  %v497_v10 = vmul.f32 %v944_v58, %v944_v58 }
 0x127   :  { %v417_v22 = vadd.f32 %v416_v13, %v886_v11  ;;  %v550_v23 = vadd.f32 %v549_v17, %v487_v16  ;;  %v491_v11 = vmul.f32 %v895_v32, %v895_v32 }
 0x129   :  { %v418_v25 = vadd.f32 %v417_v22, %v889_v19  ;;  %v551_v27 = vadd.f32 %v550_v23, %v488_v21  ;;  %v492_v19 = vmul.f32 %v907_v39, %v907_v39  ;;  %v1051_v21 = vpop.f32.mrf.mxu2 }
 0x12a   :  { %383 = vst [vmem:[#allocation7 + $0x170] sm:$0xff] %v1051_v21 }
 0x12b   :  { %v419_v28 = vadd.f32 %v418_v25, %v892_v26  ;;  %v552_v29 = vadd.f32 %v551_v27, %v489_v24  ;;  %v1053_v22 = vpop.f32.mrf.mxu3  ;;  %v499_v24 = vmul.f32 %v962_v2, %v962_v2 }
 0x12c   :  { %395 = vst [vmem:[#allocation7 + $0x1d0] sm:$0xff] %v1053_v22 }
 0x12d   :  { %v420_v34 = vadd.f32 %v419_v28, %v895_v32  ;;  %v553_v36 = vadd.f32 %v552_v29, %v490_v7  ;;  %v501_v28 = vmul.f32 %v985_v33, %v985_v33  ;;  %v502_v29 = vmul.f32 %v994_v8, %v994_v8 }
 0x12f   :  { %v421_v26 = vadd.f32 %v420_v34, %v907_v39  ;;  %v554_v37 = vadd.f32 %v553_v36, %v491_v11  ;;  %v495_v39 = vmul.f32 %v926_v50, %v926_v50 }
 0x131   :  { %v555_v45 = vadd.f32 %v554_v37, %v492_v19  ;;  %v422_v46 = vadd.f32 %v421_v26, %v914_v43  ;;  %v496_v43 = vmul.f32 %v935_v54, %v935_v54  ;;  %v286_v34 = vpop.f32.mrf.mxu2  ;;  %v503_v19 = vmul.f32 %v899_v35, %v899_v35 }
 0x132   :  { %384 = vst [vmem:[#allocation7 + $0x178] sm:$0xff] %v286_v34 }
 0x133   :  { %v423_v32 = vadd.f32 %v422_v46, %v920_v47  ;;  %v556_v53 = vadd.f32 %v555_v45, %v493_v42  ;;  %v1069_v36 = vpop.f32.mrf.mxu3 }
 0x134   :  { %396 = vst [vmem:[#allocation7 + $0x1d8] sm:$0xff] %v1069_v36 }
 0x135   :  { %v424_v61 = vadd.f32 %v423_v32, %v926_v50  ;;  %v557_v6 = vadd.f32 %v556_v53, %v494_v49  ;;  %v498_v50 = vmul.f32 %v953_v62, %v953_v62  ;;  %v506_v49 = vmul.f32 %v922_v48, %v922_v48 }
 0x137   :  { %v425_v47 = vadd.f32 %v424_v61, %v935_v54  ;;  %v558_v9 = vadd.f32 %v557_v6, %v495_v39 }
 0x139   :  { %v426_v12 = vadd.f32 %v425_v47, %v944_v58  ;;  %v559_v16 = vadd.f32 %v558_v9, %v496_v43 }
 0x13b   :  { %v427_v13 = vadd.f32 %v426_v12, %v953_v62  ;;  %v560_v17 = vadd.f32 %v559_v16, %v497_v10  ;;  %v500_v62 = vmul.f32 %v976_v14, %v976_v14  ;;  %v1084_v53 = vpop.f32.mrf.mxu3  ;;  %v510_v10 = vmul.f32 %v955_v63, %v955_v63 }
 0x13c   :  { %397 = vst [vmem:[#allocation7 + $0x1e0] sm:$0xff] %v1084_v53 }
 0x13d   :  { %v561_v54 = vadd.f32 %v560_v17, %v498_v50  ;;  %v428_v23 = vadd.f32 %v427_v13, %v962_v2  ;;  %v512_v17 = vmul.f32 %v978_v18, %v978_v18 }
 0x13f   :  { %v562_v58 = vadd.f32 %v561_v54, %v499_v24  ;;  %v429_v25 = vadd.f32 %v428_v23, %v976_v14 }
 0x141   :  { %v563_v27 = vadd.f32 %v562_v58, %v500_v62  ;;  %v430_v7 = vadd.f32 %v429_v25, %v985_v33  ;;  %v504_v33 = vmul.f32 %v910_v40, %v910_v40  ;;  %v514_v25 = vmul.f32 %v996_v15, %v996_v15 }
 0x143   :  { %v564_v11 = vadd.f32 %v563_v27, %v501_v28  ;;  %v431_v2 = vadd.f32 %v430_v7, %v994_v8  ;;  %v505_v8 = vmul.f32 %v916_v44, %v916_v44  ;;  %v515_v7 = vmul.f32 %v1015_v30, %v1015_v30 }
 0x145   :  { %v432_v14 = vadd.f32 %v431_v2, %v899_v35  ;;  %v565_v26 = vadd.f32 %v564_v11, %v502_v29  ;;  %v516_v29 = vmul.f32 %v1033_v57, %v1033_v57  ;;  %v517_v2 = vmul.f32 %v1051_v21, %v1051_v21 }
 0x147   :  { %v433_v37 = vadd.f32 %v432_v14, %v910_v40  ;;  %v566_v42 = vadd.f32 %v565_v26, %v503_v19  ;;  %v507_v40 = vmul.f32 %v928_v51, %v928_v51  ;;  %v518_v19 = vmul.f32 %v286_v34, %v286_v34 }
 0x149   :  { %v434_v45 = vadd.f32 %v433_v37, %v916_v44  ;;  %v567_v46 = vadd.f32 %v566_v42, %v504_v33  ;;  %v508_v44 = vmul.f32 %v937_v55, %v937_v55 }
 0x14b   :  { %v435_v35 = vadd.f32 %v434_v45, %v922_v48  ;;  %v568_v32 = vadd.f32 %v567_v46, %v505_v8  ;;  %v509_v48 = vmul.f32 %v946_v59, %v946_v59 }
 0x14d   :  { %v436_v39 = vadd.f32 %v435_v35, %v928_v51  ;;  %v569_v61 = vadd.f32 %v568_v32, %v506_v49  ;;  %v1099_v51 = vpop.f32.mrf.mxu3  ;;  %v523_v32 = vmul.f32 %v966_v4, %v966_v4 }
 0x14e   :  { %398 = vst [vmem:[#allocation7 + $0x1e8] sm:$0xff] %v1099_v51 }
 0x14f   :  { %v437_v6 = vadd.f32 %v436_v39, %v937_v55  ;;  %v570_v43 = vadd.f32 %v569_v61, %v507_v40  ;;  %v511_v55 = vmul.f32 %v964_v3, %v964_v3 }
 0x151   :  { %v571_v47 = vadd.f32 %v570_v43, %v508_v44  ;;  %v438_v9 = vadd.f32 %v437_v6, %v946_v59 }
 0x153   :  { %v439_v12 = vadd.f32 %v438_v9, %v955_v63  ;;  %v572_v16 = vadd.f32 %v571_v47, %v509_v48  ;;  %v513_v63 = vmul.f32 %v987_v38, %v987_v38 }
 0x155   :  { %v440_v13 = vadd.f32 %v439_v12, %v964_v3  ;;  %v573_v50 = vadd.f32 %v572_v16, %v510_v10  ;;  %v1114_v3 = vpop.f32.mrf.mxu3 }
 0x156   :  { %399 = vst [vmem:[#allocation7 + $0x1f0] sm:$0xff] %v1114_v3 }
 0x157   :  { %v441_v59 = vadd.f32 %v440_v13, %v978_v18  ;;  %v574_v54 = vadd.f32 %v573_v50, %v511_v55  ;;  %v530_v50 = vmul.f32 %v1069_v36, %v1069_v36 }
 0x159   :  { %v442_v23 = vadd.f32 %v441_v59, %v987_v38  ;;  %v575_v24 = vadd.f32 %v574_v54, %v512_v17  ;;  %v531_v54 = vmul.f32 %v1084_v53, %v1084_v53 }
 0x15b   :  { %v443_v58 = vadd.f32 %v442_v23, %v996_v15  ;;  %v576_v62 = vadd.f32 %v575_v24, %v513_v63  ;;  %v532_v23 = vmul.f32 %v1099_v51, %v1099_v51 }
 0x15d   :  { %v577_v27 = vadd.f32 %v576_v62, %v514_v25  ;;  %v444_v18 = vadd.f32 %v443_v58, %v1015_v30  ;;  %v334_v26 = vpop.f32.mrf.mxu3  ;;  %v533_v58 = vmul.f32 %v1114_v3, %v1114_v3 }
 0x15e   :  { %400 = vst [vmem:[#allocation7 + $0x1f8] sm:$0xff] %v334_v26 }
 0x15f   :  { %v578_v28 = vadd.f32 %v577_v27, %v515_v7  ;;  %v445_v38 = vadd.f32 %v444_v18, %v1033_v57  ;;  %v519_v57 = vmul.f32 %v930_v52, %v930_v52  ;;  %617 = dma.vmem_to_hbm [thread:$0]  %s610_s1, 8192, %s612_s29, [#allocation4], %s840_s23, %s840_s23, %s841_s24  }
 0x161   :  { %v579_v15 = vadd.f32 %v578_v28, %v516_v29  ;;  %v446_v11 = vadd.f32 %v445_v38, %v1051_v21  ;;  %v520_v21 = vmul.f32 %v939_v56, %v939_v56 }
 0x163   :  { %v580_v30 = vadd.f32 %v579_v15, %v517_v2  ;;  %v447_v14 = vadd.f32 %v446_v11, %v286_v34  ;;  %v521_v34 = vmul.f32 %v948_v60, %v948_v60 }
 0x165   :  { %v448_v33 = vadd.f32 %v447_v14, %v930_v52  ;;  %v581_v37 = vadd.f32 %v580_v30, %v518_v19  ;;  %v522_v52 = vmul.f32 %v957_v0, %v957_v0 }
 0x167   :  { %v449_v42 = vadd.f32 %v448_v33, %v939_v56  ;;  %v582_v8 = vadd.f32 %v581_v37, %v519_v57  ;;  %v524_v56 = vmul.f32 %v980_v20, %v980_v20 }
 0x169   :  { %v450_v45 = vadd.f32 %v449_v42, %v948_v60  ;;  %v583_v46 = vadd.f32 %v582_v8, %v520_v21  ;;  %v525_v60 = vmul.f32 %v989_v41, %v989_v41 }
 0x16b   :  { %v451_v49 = vadd.f32 %v450_v45, %v957_v0  ;;  %v584_v35 = vadd.f32 %v583_v46, %v521_v34  ;;  %v526_v0 = vmul.f32 %v998_v1, %v998_v1 }
 0x16d   :  { %v452_v40 = vadd.f32 %v451_v49, %v966_v4  ;;  %v585_v39 = vadd.f32 %v584_v35, %v522_v52  ;;  %v527_v4 = vmul.f32 %v1017_v31, %v1017_v31 }
 0x16f   :  { %v453_v61 = vadd.f32 %v452_v40, %v980_v20  ;;  %v586_v44 = vadd.f32 %v585_v39, %v523_v32  ;;  %v528_v20 = vmul.f32 %v1035_v5, %v1035_v5 }
 0x171   :  { %v587_v6 = vadd.f32 %v586_v44, %v524_v56  ;;  %v454_v43 = vadd.f32 %v453_v61, %v989_v41  ;;  %v529_v41 = vmul.f32 %v1053_v22, %v1053_v22 }
 0x173   :  { %v455_v48 = vadd.f32 %v454_v43, %v998_v1  ;;  %v588_v47 = vadd.f32 %v587_v6, %v525_v60 }
 0x175   :  { %v456_v9 = vadd.f32 %v455_v48, %v1017_v31  ;;  %v589_v10 = vadd.f32 %v588_v47, %v526_v0 }
 0x177   :  { %v457_v12 = vadd.f32 %v456_v9, %v1035_v5  ;;  %v590_v16 = vadd.f32 %v589_v10, %v527_v4 }
 0x179   :  { %v458_v55 = vadd.f32 %v457_v12, %v1053_v22  ;;  %v591_v13 = vadd.f32 %v590_v16, %v528_v20 }
 0x17b   :  { %v459_v1 = vadd.f32 %v458_v55, %v1069_v36  ;;  %v592_v17 = vadd.f32 %v591_v13, %v529_v41  ;;  %v534_v36 = vmul.f32 %v334_v26, %v334_v26 }
 0x17d   :  { %v593_v31 = vadd.f32 %v592_v17, %v530_v50  ;;  %v460_v59 = vadd.f32 %v459_v1, %v1084_v53 }
 0x17f   :  { %v594_v5 = vadd.f32 %v593_v31, %v531_v54  ;;  %v461_v63 = vadd.f32 %v460_v59, %v1099_v51 }
 0x181   :  { %v595_v22 = vadd.f32 %v594_v5, %v532_v23  ;;  %v462_v24 = vadd.f32 %v461_v63, %v1114_v3 }
 0x183   :  { %v596_v25 = vadd.f32 %v595_v22, %v533_v58  ;;  %v463_v62 = vadd.f32 %v462_v24, %v334_v26 }
 0x185   :  { %v464_v27 = vrot.slane %v463_v62, 4  ;;  %v597_v18 = vadd.f32 %v596_v25, %v534_v36 }
 0x187   :  { %v465_v7 = vadd.f32 %v464_v27, %v463_v62  ;;  %v598_v28 = vrot.slane %v597_v18, 4 }
 0x189   :  { %v466_v53 = vrot.slane %v465_v7, 2  ;;  %v599_v38 = vadd.f32 %v598_v28, %v597_v18 }
 0x18b   :  { %v467_v29 = vadd.f32 %v466_v53, %v465_v7  ;;  %v600_v15 = vrot.slane %v599_v38, 2 }
 0x18d   :  { %v601_v51 = vadd.f32 %v600_v15, %v599_v38  ;;  %v468_v11 = vrot.slane %v467_v29, 1 }
 0x18f   :  { %v469_v3 = vadd.f32 %v468_v11, %v467_v29  ;;  %v602_v2 = vrot.slane %v601_v51, 1 }
 0x191   :  { %470 = vst [vmem:[#allocation8] sm:$0x1] %v469_v3  ;;  %v603_v19 = vadd.f32 %v602_v2, %v601_v51 }
 0x192   :  { %628 = dma.vmem_to_hbm [thread:$0]  %s624_s30, 16, %s626_s7, [#allocation9]  }
 0x193   :  { %604 = vst [vmem:[#allocation10] sm:$0x1] %v603_v19 }
 0x194   :  { %639 = dma.vmem_to_hbm [thread:$0]  %s635_s9, 16, %s637_s12, [#allocation9]  }
 0x195   :  { %835 = dma.done.wait [#allocation4], 8192  }
 0x196   :  { %836 = vsyncadd [#allocation4], 4294959104 }
 0x197   :  { %837 = dma.done.wait [#allocation9], 32  }
 0x198   :  { %838 = vsyncadd [#allocation9], 4294967264 }
 0x199   :  { %652 = vsyncpa [#allocation3], 1 }
 0x19a   :  { %653 = vsyncpa [#allocation6], 1 }
 0x19b   :  { %654 = vsyncpa [#allocation4], 1 }
 0x19c   :  { %655 = vsyncpa [#allocation9], 1 }

</bundles_post_ra>
